<compile_context>
chip_gen: v7x
topology: tpu7x:2x2x1
jax: 0.10.0
libtpu: 0.0.40
codegen_flags: <defaults>
</compile_context>

<pallas_src>
import functools

import jax
import jax.numpy as jnp
from jax import lax
from jax.experimental import pallas as pl
from jax.experimental.pallas import tpu as pltpu


def _ring_loss_kernel(radius_ref, x_ref, o_ref,
                      acc_n_ref, acc_n2_ref, acc_x_ref, acc_d2_ref,
                      *, true_b, tile_b, tiles_per_core, needs_mask):
    c = pl.program_id(0)          # core-split axis ("parallel")
    i = pl.program_id(1)          # batch-tile axis ("arbitrary", carries accs)

    @pl.when(i == 0)
    def _init():
        acc_n_ref[...] = jnp.zeros_like(acc_n_ref)
        acc_n2_ref[...] = jnp.zeros_like(acc_n2_ref)
        acc_x_ref[...] = jnp.zeros_like(acc_x_ref)
        acc_d2_ref[...] = jnp.zeros_like(acc_d2_ref)

    # Upcast in-vreg (input streams in native dtype, e.g. bf16).
    x = x_ref[...].astype(jnp.float32)                         # (TB, Dp)

    if needs_mask:
        # Ragged batch (partial last tile and/or phantom tile from the 2-way
        # core split).  Mask with a cheap (TB, 1) column predicate broadcast
        # over lanes; select semantics so garbage (NaN/Inf) rows become 0
        # before any arithmetic.  The nominal (unclamped) tile index is used
        # so fully-phantom tiles (clamped to re-read the last real block) are
        # masked out entirely.
        nominal_tile = c * tiles_per_core + i
        row_ids = nominal_tile * tile_b + lax.broadcasted_iota(
            jnp.int32, (tile_b, 1), 0)
        valid = row_ids < true_b                               # (TB, 1)
        x = jnp.where(valid, x, 0.0)

    row_sq = jnp.sum(x * x, axis=1, keepdims=True)             # (TB, 1) = ||x_i||^2
    row_x = jnp.sum(x, axis=1, keepdims=True)                  # (TB, 1) = sum_j x_ij
    norms = jnp.sqrt(row_sq)                                   # (TB, 1) = ||x_i||

    r0 = radius_ref[0]
    d = norms - r0
    d2 = d * d                                                 # (TB, 1) = (||x_i|| - r)^2
    if needs_mask:
        # Masked rows have norm 0, so d2 would be r0^2 there; zero it.
        d2 = jnp.where(valid, d2, 0.0)

    nsub = tile_b // 8

    def fold8(v):
        # (TB, 1) -> (8, 1): layout-preserving reshape (rows stay on sublanes)
        # + pure VPU vreg adds.  No per-tile cross-sublane (XLU) collapse.
        return jnp.sum(v.reshape(nsub, 8, 1), axis=0)

    acc_n_ref[...] += fold8(norms)
    acc_n2_ref[...] += fold8(row_sq)
    acc_x_ref[...] += fold8(row_x)
    acc_d2_ref[...] += fold8(d2)

    @pl.when(i == pl.num_programs(1) - 1)
    def _finalize():
        # Single cross-sublane collapse per core, once.
        s_n = jnp.sum(acc_n_ref[...], keepdims=True)           # (1, 1)
        s_n2 = jnp.sum(acc_n2_ref[...], keepdims=True)
        s_x = jnp.sum(acc_x_ref[...], keepdims=True)
        s_d2 = jnp.sum(acc_d2_ref[...], keepdims=True)
        sub = lax.broadcasted_iota(jnp.int32, (8, 128), 0)
        out = jnp.where(sub == 0, s_n, 0.0)
        out = jnp.where(sub == 1, s_n2, out)
        out = jnp.where(sub == 2, s_x, out)
        out = jnp.where(sub == 3, s_d2, out)
        o_ref[...] = out                                       # (8, 128) per core


def _vmem_capacity_bytes():
    """Physical VMEM bytes of the attached chip (conservative fallback: v7x)."""
    try:
        info = pltpu.get_tpu_info()
        for name in ("vmem_capacity_bytes", "vmem_size_bytes", "vmem_bytes"):
            v = getattr(info, name, None)
            if v:
                return int(v)
    except Exception:
        pass
    return 64 * 1024 * 1024


def _pick_tile_rows(B, Dp, itemsize, vmem_budget_bytes):
    # Conservative per-row VMEM accounting:
    #   2 * itemsize * Dp   : double-buffered native input tile
    #   8 * Dp (+2 slack)   : f32 upcast tile + f32 x*x tile intermediates
    #   5 * 512             : (TB, 1) f32 per-row intermediates (lane-padded)
    per_row = Dp * (2 * itemsize + 10) + 5 * 512
    rows = vmem_budget_bytes // per_row
    return max(8, int(rows) // 8 * 8)


def ring_loss(x, radius, loss_weight, *, tile_rows=None, return_radius=False):
    """JAX/Pallas equivalent of RingLoss.forward.

    x:           (B, D) float array (any float dtype; streamed natively)
    radius:      scalar / (1,) float parameter (the nn.Parameter)
    loss_weight: python float
    returns scalar f32 loss (and the effective radius if return_radius=True)
    """
    # TODO(synk): the PyTorch module mutates self.radius in place when
    # radius < 0; JAX has no in-place parameter mutation, so the re-initialized
    # radius is only exposed via return_radius=True (caller must persist it).
    B, D = x.shape
    orig_elems = B * D
    itemsize = jnp.dtype(x.dtype).itemsize

    # Lane-density guard: pad the feature dim to a multiple of 128 so every
    # (8,128) vreg is fully occupied.  Zero padding changes neither the norms
    # nor sum(x); mean(x) below divides by the ORIGINAL element count.
    Dp = ((D + 127) // 128) * 128
    if Dp != D:
        # TODO(synk): for very large B with a non-128-multiple D this one-time
        # pad costs an extra HBM round trip; a fused ragged-lane path would
        # avoid it, but typical feature dims (128/256/512) take the no-op path.
        x = jnp.pad(x, ((0, 0), (0, Dp - D)))

    vmem_cap = _vmem_capacity_bytes()
    # 96 MiB is safe with 128 MiB physical VMEM (v5e/v6e); on v7x (64 MiB)
    # this resolves to ~48 MiB, leaving headroom.
    vmem_limit = min(96 * 1024 * 1024, max(32 * 1024 * 1024,
                                           vmem_cap - 16 * 1024 * 1024))

    if tile_rows is None:
        tb = _pick_tile_rows(B, Dp, itemsize, vmem_limit - 8 * 1024 * 1024)
    else:
        tb = max(8, (int(tile_rows) // 8) * 8)
    tb = min(tb, ((B + 7) // 8) * 8)           # never larger than the batch

    num_tiles = -(-B // tb)                    # ceil
    n_split = 2 if num_tiles >= 2 else 1       # 2-way TC split (no-op on 1-TC chips)
    tiles_per_core = -(-num_tiles // n_split)
    # Mask only if the tiling is ragged (partial last tile or phantom tiles
    # introduced by the core split); otherwise the steady state is mask-free.
    needs_mask = (B % tb != 0) or (tiles_per_core * n_split != num_tiles)

    radius_arr = jnp.asarray(radius, dtype=jnp.float32).reshape(1)

    kernel = functools.partial(
        _ring_loss_kernel,
        true_b=B, tile_b=tb, tiles_per_core=tiles_per_core,
        needs_mask=needs_mask)

    partials = pl.pallas_call(
        kernel,
        out_shape=jax.ShapeDtypeStruct((n_split * 8, 128), jnp.float32),
        grid=(n_split, tiles_per_core),
        in_specs=[
            pl.BlockSpec(memory_space=pltpu.SMEM),          # radius scalar param
            pl.BlockSpec(                                   # streamed batch tile
                (tb, Dp),
                lambda c, i: (jnp.minimum(c * tiles_per_core + i,
                                          num_tiles - 1), 0)),
        ],
        out_specs=pl.BlockSpec((8, 128), lambda c, i: (c, 0)),
        scratch_shapes=[
            pltpu.VMEM((8, 1), jnp.float32),   # partial sum ||x_i||
            pltpu.VMEM((8, 1), jnp.float32),   # partial sum ||x_i||^2
            pltpu.VMEM((8, 1), jnp.float32),   # partial sum x (radius re-init)
            pltpu.VMEM((8, 1), jnp.float32),   # partial sum (||x_i|| - r)^2
        ],
        compiler_params=pltpu.CompilerParams(
            dimension_semantics=("parallel", "arbitrary"),
            vmem_limit_bytes=int(vmem_limit),
        ),
    )(radius_arr, x)

    # Wrapper-side finalize: combine per-core partials and apply the
    # data-dependent radius branch + loss formula.
    p = partials[:, 0].reshape(n_split, 8)
    s_n = jnp.sum(p[:, 0])
    s_n2 = jnp.sum(p[:, 1])
    s_x = jnp.sum(p[:, 2])
    s_d2 = jnp.sum(p[:, 3])

    r0 = radius_arr[0]
    w = float(loss_weight)
    inv_b = 1.0 / float(B)
    mean_x = s_x * (1.0 / float(orig_elems))
    # radius < 0: r = mean(x) is only known after the pass -> expanded form.
    loss_reinit = (s_n2 - 2.0 * mean_x * s_n + float(B) * mean_x * mean_x) \
        * (0.5 * inv_b) * w
    # radius >= 0: numerically-stable direct sum accumulated in-kernel.
    loss_fixed = s_d2 * (0.5 * inv_b) * w
    loss = jnp.where(r0 < 0.0, loss_reinit, loss_fixed)

    if return_radius:
        r_eff = jnp.where(r0 < 0.0, mean_x, r0)
        return loss, r_eff
    return loss


if __name__ == "__main__":
    key = jax.random.PRNGKey(0)

    def ref_loss(x, radius, w):
        x32 = x.astype(jnp.float32)
        r = jnp.where(radius[0] < 0.0, jnp.mean(x32), radius[0])
        n = jnp.linalg.norm(x32, ord=2, axis=1)
        return jnp.mean(jnp.abs(n - r) ** 2) / 2.0 * w

    loss_weight = 0.01
    k1, k2, k3 = jax.random.split(key, 3)

    # Test 1: small (8, 32) f32, negative radius -> fused "radius = x.mean()"
    # re-init branch; feature dim padded 32 -> 128; single tile, no mask.
    x1 = jax.random.normal(k1, (8, 32), dtype=jnp.float32)
    radius_neg = jnp.array([-1.0], dtype=jnp.float32)
    out1 = ring_loss(x1, radius_neg, loss_weight)
    jax.block_until_ready(out1)
    ref1 = ref_loss(x1, radius_neg, loss_weight)
    assert jnp.allclose(out1, ref1, rtol=1e-5, atol=1e-6), (out1, ref1)

    # Test 2: positive radius -> numerically-stable direct-sum path.
    radius_pos = jnp.array([2.5], dtype=jnp.float32)
    out2 = ring_loss(x1, radius_pos, loss_weight)
    jax.block_until_ready(out2)
    ref2 = ref_loss(x1, radius_pos, loss_weight)
    assert jnp.allclose(out2, ref2, rtol=1e-5, atol=1e-6), (out2, ref2)

    # Test 3: bf16 streamed natively, ragged batch (20 rows, tile 8) ->
    # multi-tile grid, 2-way core split with a phantom tile, masked partial
    # tile; both radius branches.
    x3 = jax.random.normal(k2, (20, 128), dtype=jnp.float32).astype(jnp.bfloat16)
    out3 = ring_loss(x3, radius_neg, loss_weight, tile_rows=8)
    jax.block_until_ready(out3)
    ref3 = ref_loss(x3, radius_neg, loss_weight)
    assert jnp.allclose(out3, ref3, rtol=1e-4, atol=1e-5), (out3, ref3)
    out3b = ring_loss(x3, radius_pos, loss_weight, tile_rows=8)
    jax.block_until_ready(out3b)
    ref3b = ref_loss(x3, radius_pos, loss_weight)
    assert jnp.allclose(out3b, ref3b, rtol=1e-4, atol=1e-5), (out3b, ref3b)

    # Test 4: moderate f32 (1056, 384), forced small tile -> several tiles per
    # core, ragged last tile + phantom tile; both radius branches.
    x4 = jax.random.normal(k3, (1056, 384), dtype=jnp.float32)
    out4 = ring_loss(x4, radius_neg, loss_weight, tile_rows=256)
    jax.block_until_ready(out4)
    ref4 = ref_loss(x4, radius_neg, loss_weight)
    assert jnp.allclose(out4, ref4, rtol=2e-5, atol=1e-6), (out4, ref4)
    radius_big = jnp.array([15.0], dtype=jnp.float32)
    out5 = ring_loss(x4, radius_big, loss_weight, tile_rows=256)
    jax.block_until_ready(out5)
    ref5 = ref_loss(x4, radius_big, loss_weight)
    assert jnp.allclose(out5, ref5, rtol=2e-5, atol=1e-6), (out5, ref5)

    # Auto tile-size path (no explicit tile_rows), just to exercise it.
    out6 = ring_loss(x4, radius_big, loss_weight)
    jax.block_until_ready(out6)
    assert jnp.allclose(out6, ref5, rtol=2e-5, atol=1e-6), (out6, ref5)

    print("KERNEL_OK")
</pallas_src>

<mosaic_0001>
module attributes {stable_mosaic.version = 11 : i64} {
  func.func @_ring_loss_kernel(%arg0: i32, %arg1: i32, %arg2: memref<1xf32, #tpu.memory_space<smem>>, %arg3: memref<8x128xf32, #tpu.memory_space<vmem>>, %arg4: memref<8x128xf32, #tpu.memory_space<vmem>>, %arg5: memref<8x1xf32, #tpu.memory_space<vmem>>, %arg6: memref<8x1xf32, #tpu.memory_space<vmem>>, %arg7: memref<8x1xf32, #tpu.memory_space<vmem>>, %arg8: memref<8x1xf32, #tpu.memory_space<vmem>>) attributes {dimension_semantics = [#tpu.dimension_semantics<parallel>, #tpu.dimension_semantics<arbitrary>], iteration_bounds = array<i64: 1, 1>, scalar_prefetch = 0 : i64, scratch_operands = 4 : i64, tpu.core_type = #tpu.core_type<tc>, window_params = [{transform_indices = @transform_0, window_bounds = array<i64: 1>}, {transform_indices = @transform_1, window_bounds = array<i64: 8, 128>}, {transform_indices = @transform_2, window_bounds = array<i64: 8, 128>}]} {
    %c0_i32 = arith.constant 0 : i32
    %0 = arith.cmpi eq, %arg1, %c0_i32 : i32
    %1 = arith.extui %0 : i1 to i32
    %c0_i32_0 = arith.constant 0 : i32
    %2 = arith.cmpi ne, %1, %c0_i32_0 : i32
    scf.if %2 {
      %cst_26 = arith.constant 0.000000e+00 : f32
      %37 = vector.broadcast %cst_26 : f32 to vector<8x1xf32>
      %c0_27 = arith.constant 0 : index
      %c0_28 = arith.constant 0 : index
      %38 = vector.load %arg5[%c0_27, %c0_28] : memref<8x1xf32, #tpu.memory_space<vmem>>, vector<8x1xf32>
      tpu.vector_store %arg5[%c0_27, %c0_28], %37 {strides = array<i32>} : memref<8x1xf32, #tpu.memory_space<vmem>>, vector<8x1xf32>,
      %cst_29 = arith.constant 0.000000e+00 : f32
      %39 = vector.broadcast %cst_29 : f32 to vector<8x1xf32>
      %c0_30 = arith.constant 0 : index
      %c0_31 = arith.constant 0 : index
      %40 = vector.load %arg6[%c0_30, %c0_31] : memref<8x1xf32, #tpu.memory_space<vmem>>, vector<8x1xf32>
      tpu.vector_store %arg6[%c0_30, %c0_31], %39 {strides = array<i32>} : memref<8x1xf32, #tpu.memory_space<vmem>>, vector<8x1xf32>,
      %cst_32 = arith.constant 0.000000e+00 : f32
      %41 = vector.broadcast %cst_32 : f32 to vector<8x1xf32>
      %c0_33 = arith.constant 0 : index
      %c0_34 = arith.constant 0 : index
      %42 = vector.load %arg7[%c0_33, %c0_34] : memref<8x1xf32, #tpu.memory_space<vmem>>, vector<8x1xf32>
      tpu.vector_store %arg7[%c0_33, %c0_34], %41 {strides = array<i32>} : memref<8x1xf32, #tpu.memory_space<vmem>>, vector<8x1xf32>,
      %cst_35 = arith.constant 0.000000e+00 : f32
      %43 = vector.broadcast %cst_35 : f32 to vector<8x1xf32>
      %c0_36 = arith.constant 0 : index
      %c0_37 = arith.constant 0 : index
      %44 = vector.load %arg8[%c0_36, %c0_37] : memref<8x1xf32, #tpu.memory_space<vmem>>, vector<8x1xf32>
      tpu.vector_store %arg8[%c0_36, %c0_37], %43 {strides = array<i32>} : memref<8x1xf32, #tpu.memory_space<vmem>>, vector<8x1xf32>,
    } else {
    }
    %c0 = arith.constant 0 : index
    %c0_1 = arith.constant 0 : index
    %3 = vector.load %arg3[%c0, %c0_1] : memref<8x128xf32, #tpu.memory_space<vmem>>, vector<8x128xf32>
    %4 = arith.mulf %3, %3 : vector<8x128xf32>
    %cst = arith.constant dense<0.000000e+00> : vector<8xf32>
    %5 = vector.multi_reduction <add>, %4, %cst [1] : vector<8x128xf32> to vector<8xf32>
    %6 = vector.shape_cast %5 : vector<8xf32> to vector<8x1xf32>
    %cst_2 = arith.constant dense<0.000000e+00> : vector<8xf32>
    %7 = vector.multi_reduction <add>, %3, %cst_2 [1] : vector<8x128xf32> to vector<8xf32>
    %8 = vector.shape_cast %7 : vector<8xf32> to vector<8x1xf32>
    %9 = math.sqrt %6 : vector<8x1xf32>
    %c0_3 = arith.constant 0 : index
    %10 = memref.load %arg2[%c0_3] : memref<1xf32, #tpu.memory_space<smem>>
    %11 = vector.broadcast %10 : f32 to vector<8x1xf32>
    %12 = arith.subf %9, %11 : vector<8x1xf32>
    %13 = arith.mulf %12, %12 : vector<8x1xf32>
    %c0_4 = arith.constant 0 : index
    %c0_5 = arith.constant 0 : index
    %14 = vector.load %arg5[%c0_4, %c0_5] : memref<8x1xf32, #tpu.memory_space<vmem>>, vector<8x1xf32>
    %15 = vector.shape_cast %9 : vector<8x1xf32> to vector<1x8x1xf32>
    %cst_6 = arith.constant dense<0.000000e+00> : vector<8x1xf32>
    %16 = vector.multi_reduction <add>, %15, %cst_6 [0] : vector<1x8x1xf32> to vector<8x1xf32>
    %17 = arith.addf %14, %16 : vector<8x1xf32>
    %c0_7 = arith.constant 0 : index
    %c0_8 = arith.constant 0 : index
    %18 = vector.load %arg5[%c0_7, %c0_8] : memref<8x1xf32, #tpu.memory_space<vmem>>, vector<8x1xf32>
    tpu.vector_store %arg5[%c0_7, %c0_8], %17 {strides = array<i32>} : memref<8x1xf32, #tpu.memory_space<vmem>>, vector<8x1xf32>,
    %c0_9 = arith.constant 0 : index
    %c0_10 = arith.constant 0 : index
    %19 = vector.load %arg6[%c0_9, %c0_10] : memref<8x1xf32, #tpu.memory_space<vmem>>, vector<8x1xf32>
    %20 = vector.shape_cast %6 : vector<8x1xf32> to vector<1x8x1xf32>
    %cst_11 = arith.constant dense<0.000000e+00> : vector<8x1xf32>
    %21 = vector.multi_reduction <add>, %20, %cst_11 [0] : vector<1x8x1xf32> to vector<8x1xf32>
    %22 = arith.addf %19, %21 : vector<8x1xf32>
    %c0_12 = arith.constant 0 : index
    %c0_13 = arith.constant 0 : index
    %23 = vector.load %arg6[%c0_12, %c0_13] : memref<8x1xf32, #tpu.memory_space<vmem>>, vector<8x1xf32>
    tpu.vector_store %arg6[%c0_12, %c0_13], %22 {strides = array<i32>} : memref<8x1xf32, #tpu.memory_space<vmem>>, vector<8x1xf32>,
    %c0_14 = arith.constant 0 : index
    %c0_15 = arith.constant 0 : index
    %24 = vector.load %arg7[%c0_14, %c0_15] : memref<8x1xf32, #tpu.memory_space<vmem>>, vector<8x1xf32>
    %25 = vector.shape_cast %8 : vector<8x1xf32> to vector<1x8x1xf32>
    %cst_16 = arith.constant dense<0.000000e+00> : vector<8x1xf32>
    %26 = vector.multi_reduction <add>, %25, %cst_16 [0] : vector<1x8x1xf32> to vector<8x1xf32>
    %27 = arith.addf %24, %26 : vector<8x1xf32>
    %c0_17 = arith.constant 0 : index
    %c0_18 = arith.constant 0 : index
    %28 = vector.load %arg7[%c0_17, %c0_18] : memref<8x1xf32, #tpu.memory_space<vmem>>, vector<8x1xf32>
    tpu.vector_store %arg7[%c0_17, %c0_18], %27 {strides = array<i32>} : memref<8x1xf32, #tpu.memory_space<vmem>>, vector<8x1xf32>,
    %c0_19 = arith.constant 0 : index
    %c0_20 = arith.constant 0 : index
    %29 = vector.load %arg8[%c0_19, %c0_20] : memref<8x1xf32, #tpu.memory_space<vmem>>, vector<8x1xf32>
    %30 = vector.shape_cast %13 : vector<8x1xf32> to vector<1x8x1xf32>
    %cst_21 = arith.constant dense<0.000000e+00> : vector<8x1xf32>
    %31 = vector.multi_reduction <add>, %30, %cst_21 [0] : vector<1x8x1xf32> to vector<8x1xf32>
    %32 = arith.addf %29, %31 : vector<8x1xf32>
    %c0_22 = arith.constant 0 : index
    %c0_23 = arith.constant 0 : index
    %33 = vector.load %arg8[%c0_22, %c0_23] : memref<8x1xf32, #tpu.memory_space<vmem>>, vector<8x1xf32>
    tpu.vector_store %arg8[%c0_22, %c0_23], %32 {strides = array<i32>} : memref<8x1xf32, #tpu.memory_space<vmem>>, vector<8x1xf32>,
    %c0_i32_24 = arith.constant 0 : i32
    %34 = arith.cmpi eq, %arg1, %c0_i32_24 : i32
    %35 = arith.extui %34 : i1 to i32
    %c0_i32_25 = arith.constant 0 : i32
    %36 = arith.cmpi ne, %35, %c0_i32_25 : i32
    scf.if %36 {
      %c0_26 = arith.constant 0 : index
      %c0_27 = arith.constant 0 : index
      %37 = vector.load %arg5[%c0_26, %c0_27] : memref<8x1xf32, #tpu.memory_space<vmem>>, vector<8x1xf32>
      %38 = vector.shape_cast %37 : vector<8x1xf32> to vector<1x8x1xf32>
      %cst_28 = arith.constant dense<0.000000e+00> : vector<1xf32>
      %39 = vector.multi_reduction <add>, %38, %cst_28 [1, 2] : vector<1x8x1xf32> to vector<1xf32>
      %40 = vector.shape_cast %39 : vector<1xf32> to vector<1x1x1xf32>
      %41 = vector.extract %40[0, 0, 0] : f32 from vector<1x1x1xf32>
      %42 = vector.broadcast %41 : f32 to vector<1x1xf32>
      %c0_29 = arith.constant 0 : index
      %c0_30 = arith.constant 0 : index
      %43 = vector.load %arg6[%c0_29, %c0_30] : memref<8x1xf32, #tpu.memory_space<vmem>>, vector<8x1xf32>
      %44 = vector.shape_cast %43 : vector<8x1xf32> to vector<1x8x1xf32>
      %cst_31 = arith.constant dense<0.000000e+00> : vector<1xf32>
      %45 = vector.multi_reduction <add>, %44, %cst_31 [1, 2] : vector<1x8x1xf32> to vector<1xf32>
      %46 = vector.shape_cast %45 : vector<1xf32> to vector<1x1x1xf32>
      %47 = vector.extract %46[0, 0, 0] : f32 from vector<1x1x1xf32>
      %48 = vector.broadcast %47 : f32 to vector<1x1xf32>
      %c0_32 = arith.constant 0 : index
      %c0_33 = arith.constant 0 : index
      %49 = vector.load %arg7[%c0_32, %c0_33] : memref<8x1xf32, #tpu.memory_space<vmem>>, vector<8x1xf32>
      %50 = vector.shape_cast %49 : vector<8x1xf32> to vector<1x8x1xf32>
      %cst_34 = arith.constant dense<0.000000e+00> : vector<1xf32>
      %51 = vector.multi_reduction <add>, %50, %cst_34 [1, 2] : vector<1x8x1xf32> to vector<1xf32>
      %52 = vector.shape_cast %51 : vector<1xf32> to vector<1x1x1xf32>
      %53 = vector.extract %52[0, 0, 0] : f32 from vector<1x1x1xf32>
      %54 = vector.broadcast %53 : f32 to vector<1x1xf32>
      %c0_35 = arith.constant 0 : index
      %c0_36 = arith.constant 0 : index
      %55 = vector.load %arg8[%c0_35, %c0_36] : memref<8x1xf32, #tpu.memory_space<vmem>>, vector<8x1xf32>
      %56 = vector.shape_cast %55 : vector<8x1xf32> to vector<1x8x1xf32>
      %cst_37 = arith.constant dense<0.000000e+00> : vector<1xf32>
      %57 = vector.multi_reduction <add>, %56, %cst_37 [1, 2] : vector<1x8x1xf32> to vector<1xf32>
      %58 = vector.shape_cast %57 : vector<1xf32> to vector<1x1x1xf32>
      %59 = vector.extract %58[0, 0, 0] : f32 from vector<1x1x1xf32>
      %60 = vector.broadcast %59 : f32 to vector<1x1xf32>
      %61 = tpu.iota {dimensions = array<i32: 0>} : vector<8x128xi32>
      %c0_i32_38 = arith.constant 0 : i32
      %62 = vector.broadcast %c0_i32_38 : i32 to vector<8x128xi32>
      %63 = arith.cmpi eq, %61, %62 : vector<8x128xi32>
      %cst_39 = arith.constant 0.000000e+00 : f32
      %64 = vector.shape_cast %42 : vector<1x1xf32> to vector<1x1xf32>
      %65 = vector.broadcast %64 : vector<1x1xf32> to vector<8x128xf32>
      %66 = vector.broadcast %cst_39 : f32 to vector<8x128xf32>
      %67 = arith.select %63, %65, %66 : vector<8x128xi1>, vector<8x128xf32>
      %c1_i32 = arith.constant 1 : i32
      %68 = vector.broadcast %c1_i32 : i32 to vector<8x128xi32>
      %69 = arith.cmpi eq, %61, %68 : vector<8x128xi32>
      %70 = vector.shape_cast %48 : vector<1x1xf32> to vector<1x1xf32>
      %71 = vector.broadcast %70 : vector<1x1xf32> to vector<8x128xf32>
      %72 = arith.select %69, %71, %67 : vector<8x128xi1>, vector<8x128xf32>
      %c2_i32 = arith.constant 2 : i32
      %73 = vector.broadcast %c2_i32 : i32 to vector<8x128xi32>
      %74 = arith.cmpi eq, %61, %73 : vector<8x128xi32>
      %75 = vector.shape_cast %54 : vector<1x1xf32> to vector<1x1xf32>
      %76 = vector.broadcast %75 : vector<1x1xf32> to vector<8x128xf32>
      %77 = arith.select %74, %76, %72 : vector<8x128xi1>, vector<8x128xf32>
      %c3_i32 = arith.constant 3 : i32
      %78 = vector.broadcast %c3_i32 : i32 to vector<8x128xi32>
      %79 = arith.cmpi eq, %61, %78 : vector<8x128xi32>
      %80 = vector.shape_cast %60 : vector<1x1xf32> to vector<1x1xf32>
      %81 = vector.broadcast %80 : vector<1x1xf32> to vector<8x128xf32>
      %82 = arith.select %79, %81, %77 : vector<8x128xi1>, vector<8x128xf32>
      %c0_40 = arith.constant 0 : index
      %c0_41 = arith.constant 0 : index
      %83 = vector.load %arg4[%c0_40, %c0_41] : memref<8x128xf32, #tpu.memory_space<vmem>>, vector<8x128xf32>
      tpu.vector_store %arg4[%c0_40, %c0_41], %82 {strides = array<i32>} : memref<8x128xf32, #tpu.memory_space<vmem>>, vector<8x128xf32>,
    } else {
    }
    return
  }
  func.func @transform_0(%arg0: i32, %arg1: i32) -> i32 {
    %c0_i32 = arith.constant 0 : i32
    %c0_i32_0 = arith.constant 0 : i32
    return %c0_i32 : i32
  }
  func.func @transform_1(%arg0: i32, %arg1: i32) -> (i32, i32) {
    %c1_i32 = arith.constant 1 : i32
    %0 = arith.muli %arg0, %c1_i32 : i32
    %1 = arith.addi %0, %arg1 : i32
    %c0_i32 = arith.constant 0 : i32
    %2 = arith.minsi %1, %c0_i32 : i32
    %c0_i32_0 = arith.constant 0 : i32
    %c0_i32_1 = arith.constant 0 : i32
    return %2, %c0_i32_0 : i32, i32
  }
  func.func @transform_2(%arg0: i32, %arg1: i32) -> (i32, i32) {
    %c0_i32 = arith.constant 0 : i32
    %c0_i32_0 = arith.constant 0 : i32
    return %arg0, %c0_i32 : i32, i32
  }
}

</mosaic_0001>

<bundles_post_ra>
// kernel: tpu_custom_call.1
= control target key start
LH: loop header
LB: loop body
LE: loop exit
PB: predicated region body
PF: predicated region fallthrough
CT: control target
= control target key end

     0   :  { %8 = vsyncpa [#allocation8], 0  ;;  %s273_s0 = inlined_call_operand.<no memory space> [shape: f32[1], index: 0, kind: input, shape index: {}]   ;;  %s274_s1 = inlined_call_operand.hbm [shape: f32[8,128], index: 1, kind: input, shape index: {}]   ;;  %s275_s2 = inlined_call_operand.hbm [shape: f32[8,128], index: 2, kind: output, shape index: {}]  }
   0x1   :  { %9 = vsyncpa [#allocation9], 0  ;;  %s216_s9 = smov [#allocation7]   ;;  %s168_s13 = scalar_lea.hbm %s274_s1, 128 }
   0x2   :  { %s23_s10 = sshll.u32 %s216_s9, 4  ;;  %p169_p0 = scmp.ne.s32.totalorder %s274_s1, %s168_s13  ;;  %s24_s10 = int_to_ptr.vmem [resolvable:$true] %s23_s10 }
   0x3   :  { %p172_p1 = scmp.lt.u32.totalorder %s168_s13, %s274_s1 }
   0x5   :  { %p174_p2 = pnand %p172_p1, %p169_p0 }
   0x7   :  { %177 = shalt.err (!%p174_p2)
}
   0x8   :  { %s178_s18 = scalar_lea.vmem %s24_s10, 128  ;;  %p183_p4 = scmp.lt.s32.totalorder %s24_s10, %s24_s10 }
   0x9   :  { %p179_p3 = scmp.ne.s32.totalorder %s24_s10, %s178_s18  ;;  %p184_p5 = scmp.lt.s32.totalorder %s178_s18, %s178_s18 }
   0xb   :  { %p185_p6 = por %p184_p5, %p183_p4 }
   0xd   :  { %p186_p7 = pnand %p185_p6, %p179_p3 }
   0xf   :  { %189 = shalt.err (!%p186_p7)
}
  0x10   :  { %26 = dma.hbm_to_vmem [thread:$0]  %s274_s1, 128, %s24_s10, [#allocation8]  }
  0x11   :  { %212 = dma.done.wait [#allocation8], 128  }
  0x12   :  { %213 = vsyncadd [#allocation8], 4294967168  ;;  %vm37_vm0 = vcmask 7168   ;;  %v217_v0 = vmov 0.0   ;;  %v42_v1 = vld [vmem:[#allocation7] sm:$0xff]  ;;  %v56_v13 = vstv %s273_s0  ;;  %v123_v57 = vlaneseq  ;;  %s218_s24 = smov [#allocation10]  }
  0x13   :  { %38 = vst.msk [vmem:[#allocation2] sm:$0xff] %vm37_vm0, %v217_v0  ;;  %39 = vst.msk [vmem:[#allocation3] sm:$0xff] %vm37_vm0, %v217_v0  ;;  %v43_v2 = vmul.f32 %v42_v1, %v42_v1  ;;  %s144_s25 = sshll.u32 %s218_s24, 4  ;;  %s145_s25 = int_to_ptr.vmem [resolvable:$true] %s144_s25 }
  0x14   :  { %41 = vst.msk [vmem:[#allocation5] sm:$0xff] %vm37_vm0, %v217_v0  ;;  %40 = vst.msk [vmem:[#allocation4] sm:$0xff] %vm37_vm0, %v217_v0  ;;  %v124_v58 = vshrl.u32 %v123_v57, 7  ;;  %s190_s27 = scalar_lea.vmem %s145_s25, 128  ;;  %p195_p9 = scmp.lt.s32.totalorder %s145_s25, %s145_s25 }
  0x15   :  { %44 = vadd.xlane.f32.xlu0 %v43_v2  ;;  %p191_p8 = scmp.ne.s32.totalorder %s145_s25, %s190_s27  ;;  %p196_p10 = scmp.lt.s32.totalorder %s190_s27, %s190_s27 }
  0x16   :  { %vm125_vm3 = vcmp.eq.s32.totalorder %v124_v58, 0  ;;  %vm128_vm4 = vcmp.eq.s32.totalorder %v124_v58, 1  ;;  %vm131_vm5 = vcmp.eq.s32.totalorder %v124_v58, 2  ;;  %vm134_vm6 = vcmp.eq.s32.totalorder %v124_v58, 3 }
  0x17   :  { %p197_p11 = por %p196_p10, %p195_p9 }
  0x19   :  { %46 = vadd.xlane.f32.xlu0 %v42_v1  ;;  %p198_p12 = pnand %p197_p11, %p191_p8 }
  0x1a   :  { %v64_v3 = vld [vmem:[#allocation3] sm:$0xff]  ;;  %v59_v15 = vld [vmem:[#allocation2] sm:$0xff] }
  0x1b   :  { %v68_v6 = vld [vmem:[#allocation4] sm:$0xff]  ;;  %v72_v22 = vld [vmem:[#allocation5] sm:$0xff] }
  0xa2   :  { %v45_v4 = vpop.xlane.xlu0 %44 }
  0xa3   :  { %166 = vrsqrt.f32 %v45_v4  ;;  %v66_v5 = vadd.f32 %v64_v3, %v45_v4  ;;  %vm50_vm1 = vcmp.eq.f32.partialorder %v45_v4, inf  ;;  %v53_v14 = vand.u32 2147483648, %v45_v4 }
  0xa4   :  { %vm52_vm2 = vcmp.eq.f32.partialorder %v45_v4, 0.0 }
  0xa5   :  { %67 = vst.msk [vmem:[#allocation3] sm:$0xff] %vm37_vm0, %v66_v5 }
  0xa6   :  { %v47_v7 = vpop.xlane.xlu0 %46 }
  0xa7   :  { %v70_v8 = vadd.f32 %v68_v6, %v47_v7 }
  0xa9   :  { %71 = vst.msk [vmem:[#allocation4] sm:$0xff] %vm37_vm0, %v70_v8 }
  0xac   :  { %v90_v10 = vld [vmem:[#allocation3] sm:$0xff] }
  0xad   :  { %v167_v9 = vpop.eup %166  ;;  %v91_v12 = vsel %vm37_vm0, %v90_v10, 0.0 }
  0xae   :  { %v49_v11 = vmul.f32 %v167_v9, %v45_v4  ;;  %92 = vadd.xlane.f32.xlu1 %v91_v12 }
  0xb0   :  { %v51_v16 = vsel %vm50_vm1, %v45_v4, %v49_v11  ;;  %v101_v17 = vld [vmem:[#allocation4] sm:$0xff] }
  0xb1   :  { %v54_v18 = vsel %vm52_vm2, %v53_v14, %v51_v16  ;;  %v102_v19 = vsel %vm37_vm0, %v101_v17, 0.0 }
  0xb2   :  { %v57_v20 = vsub.f32 %v54_v18, %v56_v13  ;;  %v61_v21 = vadd.f32 %v59_v15, %v54_v18  ;;  %103 = vadd.xlane.f32.xlu0 %v102_v19 }
  0xb4   :  { %v58_v23 = vmul.f32 %v57_v20, %v57_v20  ;;  %63 = vst.msk [vmem:[#allocation2] sm:$0xff] %vm37_vm0, %v61_v21 }
  0xb6   :  { %v74_v24 = vadd.f32 %v72_v22, %v58_v23 }
  0xb8   :  { %75 = vst.msk [vmem:[#allocation5] sm:$0xff] %vm37_vm0, %v74_v24 }
  0xbb   :  { %v79_v25 = vld [vmem:[#allocation2] sm:$0xff] }
  0xbc   :  { %v80_v26 = vsel %vm37_vm0, %v79_v25, 0.0 }
  0xbd   :  { %81 = vadd.xlane.f32.xlu1 %v80_v26 }
  0xbf   :  { %v112_v27 = vld [vmem:[#allocation5] sm:$0xff] }
  0xc0   :  { %v113_v28 = vsel %vm37_vm0, %v112_v27, 0.0 }
  0xc1   :  { %114 = vadd.xlane.f32.xlu1 %v113_v28 }
 0x13b   :  { %v93_v29 = vpop.xlane.xlu1 %92 }
 0x13c   :  { %v94_v31 = vrot.slane %v93_v29, 4 }
 0x13e   :  { %v95_v33 = vadd.f32 %v94_v31, %v93_v29 }
 0x13f   :  { %v104_v30 = vpop.xlane.xlu0 %103 }
 0x140   :  { %v105_v32 = vrot.slane %v104_v30, 4  ;;  %v96_v35 = vrot.slane %v95_v33, 2 }
 0x142   :  { %v106_v34 = vadd.f32 %v105_v32, %v104_v30  ;;  %v97_v41 = vadd.f32 %v96_v35, %v95_v33 }
 0x144   :  { %v107_v37 = vrot.slane %v106_v34, 2  ;;  %v98_v47 = vrot.slane %v97_v41, 1 }
 0x146   :  { %v108_v42 = vadd.f32 %v107_v37, %v106_v34  ;;  %v99_v53 = vadd.f32 %v98_v47, %v97_v41 }
 0x148   :  { %v109_v50 = vrot.slane %v108_v42, 1 }
 0x14a   :  { %v82_v36 = vpop.xlane.xlu1 %81  ;;  %v110_v54 = vadd.f32 %v109_v50, %v108_v42 }
 0x14b   :  { %v83_v38 = vrot.slane %v82_v36, 4 }
 0x14d   :  { %v84_v39 = vadd.f32 %v83_v38, %v82_v36 }
 0x14e   :  { %v115_v40 = vpop.xlane.xlu1 %114 }
 0x14f   :  { %v85_v43 = vrot.slane %v84_v39, 2  ;;  %v116_v44 = vrot.slane %v115_v40, 4 }
 0x151   :  { %v117_v45 = vadd.f32 %v116_v44, %v115_v40  ;;  %v86_v46 = vadd.f32 %v85_v43, %v84_v39 }
 0x153   :  { %v118_v48 = vrot.slane %v117_v45, 2  ;;  %v87_v49 = vrot.slane %v86_v46, 1 }
 0x155   :  { %v119_v51 = vadd.f32 %v118_v48, %v117_v45  ;;  %v88_v52 = vadd.f32 %v87_v49, %v86_v46 }
 0x157   :  { %155 = vpush %v88_v52  ;;  %v120_v55 = vrot.slane %v119_v51, 1 }
 0x158   :  { %157 = vpush %v99_v53 }
 0x159   :  { %159 = vpush %v110_v54  ;;  %v121_v56 = vadd.f32 %v120_v55, %v119_v51 }
 0x15b   :  { %161 = vpush %v121_v56 }
 0x188   :  { %s156_s0 = spop %155 }
 0x189   :  { %v126_v59 = vstv %s156_s0  ;;  %s158_s22 = spop %157 }
 0x18a   :  { %v127_v60 = vsel %vm125_vm3, %v126_v59, 0.0  ;;  %v129_v61 = vstv %s158_s22  ;;  %s160_s23 = spop %159 }
 0x18b   :  { %v130_v62 = vsel %vm128_vm4, %v129_v61, %v127_v60  ;;  %v132_v63 = vstv %s160_s23 }
 0x18c   :  { %v133_v0 = vsel %vm131_vm5, %v132_v63, %v130_v62  ;;  %s162_s26 = spop %161 }
 0x18d   :  { %v135_v1 = vstv %s162_s26 }
 0x18e   :  { %v136_v2 = vsel %vm134_vm6, %v135_v1, %v133_v0 }
 0x18f   :  { %137 = vst [vmem:[#allocation10] sm:$0xff] %v136_v2 }
 0x190   :  { %201 = shalt.err (!%p198_p12)
}
 0x191   :  { %s202_s30 = scalar_lea.hbm %s275_s2, 128 }
 0x192   :  { %p203_p13 = scmp.ne.s32.totalorder %s275_s2, %s202_s30  ;;  %p206_p0 = scmp.lt.u32.totalorder %s202_s30, %s275_s2 }
 0x194   :  { %p208_p1 = pnand %p206_p0, %p203_p13 }
 0x196   :  { %211 = shalt.err (!%p208_p1)
}
 0x197   :  { %147 = dma.vmem_to_hbm [thread:$0]  %s145_s25, 128, %s275_s2, [#allocation9]  }
 0x198   :  { %214 = dma.done.wait [#allocation9], 128  }
 0x199   :  { %215 = vsyncadd [#allocation9], 4294967168 }
 0x19a   :  { %151 = vsyncpa [#allocation8], 1 }
 0x19b   :  { %152 = vsyncpa [#allocation9], 1 }

</bundles_post_ra>
